<compile_context>
chip_gen: v7x
topology: tpu7x:2x2x1
jax: 0.10.0
libtpu: 0.0.40
codegen_flags: <defaults>
</compile_context>

<pallas_src>
import jax
import jax.numpy as jnp
from jax.experimental import pallas as pl
from jax.experimental.pallas import tpu as pltpu


# --------------------------------------------------------------------------- #
# Kernel 1: the small 6-layer MLP (encoder tail + decoder head), un-gridded.
# --------------------------------------------------------------------------- #
def mlp_kernel(h0_ref, tagadd_ref,
               w1_ref, b1_ref, w2_ref, b2_ref, w3_ref, b3_ref,
               w4_ref, b4_ref, w5_ref, b5_ref, w6_ref, b6_ref,
               h_out_ref):
    relu = lambda v: jnp.maximum(v, 0.0)
    dot = lambda a, w_ref: jnp.dot(a, w_ref[...],
                                   preferred_element_type=jnp.float32)

    # encoder (reduction_emb == 'sum'): h0 is already sum over S of emb(x+1)
    h = relu(h0_ref[...])                                  # (B, D0)
    h = relu(dot(h, w1_ref) + b1_ref[...])                 # (B, D1)
    h = relu(dot(h, w2_ref) + b2_ref[...])                 # (B, D2)
    z = relu(dot(h, w3_ref) + b3_ref[...])                 # (B, D3)
    z = z + tagadd_ref[...]                                # + z_tag[tag] (zeros if tag None)

    # decoder
    h = relu(dot(z, w4_ref) + b4_ref[...])                 # (B, D2)
    h = relu(dot(h, w5_ref) + b5_ref[...])                 # (B, D1)
    h = relu(dot(h, w6_ref) + b6_ref[...])                 # (B, D0)
    h_out_ref[...] = h


# --------------------------------------------------------------------------- #
# Kernel 2: inv projection (B,D0) x (D0, Nsongs), tiled over Nsongs.
# --------------------------------------------------------------------------- #
def proj_kernel(h_ref, winv_ref, binv_ref, o_ref):
    o_ref[...] = (jnp.dot(h_ref[...], winv_ref[...],
                          preferred_element_type=jnp.float32)
                  + binv_ref[...])


# --------------------------------------------------------------------------- #
# Parameter init (torch nn.Linear style: W is (out, in)) and one-time prep.
# --------------------------------------------------------------------------- #
def init_params(key, Nsongs, dim, Nmeta_classes):
    d0, d1, d2, d3 = dim
    ks = jax.random.split(key, 16)

    def lin(kw, kb, n_in, n_out):
        bound = 1.0 / jnp.sqrt(n_in)
        w = jax.random.uniform(kw, (n_out, n_in), jnp.float32, -bound, bound)
        b = jax.random.uniform(kb, (n_out,), jnp.float32, -bound, bound)
        return w, b

    p = {}
    p["emb"] = jax.random.normal(ks[0], (Nsongs + 1, d0), jnp.float32)
    p["w1"], p["b1"] = lin(ks[1], ks[2], d0, d1)
    p["w2"], p["b2"] = lin(ks[3], ks[4], d1, d2)
    p["w3"], p["b3"] = lin(ks[5], ks[6], d2, d3)
    p["w4"], p["b4"] = lin(ks[7], ks[8], d3, d2)
    p["w5"], p["b5"] = lin(ks[9], ks[10], d2, d1)
    p["w6"], p["b6"] = lin(ks[11], ks[12], d1, d0)
    p["winv"], _ = lin(ks[13], ks[14], d0, Nsongs)
    # TODO(synk): torch module copies inv.bias from 'results/metadata/bias_inicialization';
    # we use a deterministic random bias instead of loading a checkpoint.
    p["binv"] = jax.random.normal(ks[14], (Nsongs,), jnp.float32) * 0.01
    p["z_tag"] = jax.random.uniform(ks[15], (Nmeta_classes, d3), jnp.float32)
    return p


def prepare_params(params, proj_dtype=jnp.bfloat16, tile_n=512):
    """One-time prep (call once, reuse across forwards):
       * emb row 0 pre-zeroed (padding_idx=0 forward semantics),
       * weights transposed to (in, out), biases reshaped to (1, out),
       * winv/binv padded to a multiple of tile_n (lane-dense, multiple of 128),
       * winv optionally cast to bf16 (dominant streamed operand).
       tile_n guidance: 512-2048 on v5e/v6e (128 MiB VMEM); halve on v7x (64 MiB)."""
    assert tile_n % 128 == 0, "tile_n must be a multiple of 128 (lane-dense stores)"
    Nsongs = params["winv"].shape[0]
    n_pad = pl.cdiv(Nsongs, tile_n) * tile_n

    prepped = {"tile_n": tile_n, "Nsongs": Nsongs, "n_pad": n_pad}
    prepped["emb"] = params["emb"].at[0].set(0.0)
    for name in ("w1", "w2", "w3", "w4", "w5", "w6"):
        prepped[name] = jnp.transpose(params[name])                    # (in, out)
    for name in ("b1", "b2", "b3", "b4", "b5", "b6"):
        prepped[name] = params[name].reshape(1, -1)                    # (1, out)

    winv_t = jnp.transpose(params["winv"])                             # (D0, Nsongs)
    winv_t = jnp.pad(winv_t, ((0, 0), (0, n_pad - Nsongs)))
    prepped["winv"] = winv_t.astype(proj_dtype)
    prepped["binv"] = jnp.pad(params["binv"], (0, n_pad - Nsongs)).reshape(1, -1)
    prepped["z_tag"] = params["z_tag"]
    return prepped


# --------------------------------------------------------------------------- #
# Forward
# --------------------------------------------------------------------------- #
def mlph6_forward(x, prepped, tag=None):
    """x: (B, S) int32.  Returns (xhat, None) like the torch forward."""
    B = x.shape[0]
    D0 = prepped["w1"].shape[0]
    D3 = prepped["w3"].shape[1]
    Nsongs, n_pad, tile_n = prepped["Nsongs"], prepped["n_pad"], prepped["tile_n"]

    # --- glue (XLA): gather + sum over S; S× less kernel DMA ---
    e = jnp.take(prepped["emb"], x + 1, axis=0)            # (B, S, D0)
    h0 = jnp.sum(e, axis=1)                                # (B, D0)

    if tag is None:
        tag_add = jnp.zeros((B, D3), jnp.float32)
    else:
        tag_add = jnp.take(prepped["z_tag"], tag, axis=0)  # (B, D3)

    # --- kernel 1: small MLP, everything VMEM-resident, no grid ---
    mlp_args = [h0, tag_add,
                prepped["w1"], prepped["b1"], prepped["w2"], prepped["b2"],
                prepped["w3"], prepped["b3"], prepped["w4"], prepped["b4"],
                prepped["w5"], prepped["b5"], prepped["w6"], prepped["b6"]]
    h = pl.pallas_call(
        mlp_kernel,
        out_shape=jax.ShapeDtypeStruct((B, D0), jnp.float32),
        in_specs=[pl.BlockSpec(memory_space=pltpu.MemorySpace.VMEM)] * len(mlp_args),
        out_specs=pl.BlockSpec(memory_space=pltpu.MemorySpace.VMEM),
    )(*mlp_args)

    # --- kernel 2: inv projection tiled over (padded) Nsongs, parallel grid ---
    h_proj = h.astype(prepped["winv"].dtype)               # bf16 feed if winv is bf16
    grid = (n_pad // tile_n,)
    xhat_pad = pl.pallas_call(
        proj_kernel,
        out_shape=jax.ShapeDtypeStruct((B, n_pad), jnp.float32),
        grid=grid,
        in_specs=[
            pl.BlockSpec((B, D0), lambda n: (0, 0)),          # h: resident
            pl.BlockSpec((D0, tile_n), lambda n: (0, n)),     # winv: streamed tiles
            pl.BlockSpec((1, tile_n), lambda n: (0, n)),      # binv tile
        ],
        out_specs=pl.BlockSpec((B, tile_n), lambda n: (0, n)),
        compiler_params=pltpu.CompilerParams(
            dimension_semantics=("parallel",)),               # megacore-shardable on v7x
    )(h_proj, prepped["winv"], prepped["binv"])

    xhat = xhat_pad[:, :Nsongs]
    return xhat, None


# --------------------------------------------------------------------------- #
# Pure-JAX reference mirroring the torch forward (reduction_emb='sum', f32)
# --------------------------------------------------------------------------- #
def mlph6_reference(x, params, tag=None):
    relu = lambda v: jnp.maximum(v, 0.0)
    emb = params["emb"].at[0].set(0.0)
    h = relu(jnp.take(emb, x + 1, axis=0).sum(axis=1))
    h = relu(h @ params["w1"].T + params["b1"])
    h = relu(h @ params["w2"].T + params["b2"])
    z = relu(h @ params["w3"].T + params["b3"])
    if tag is not None:
        z = z + params["z_tag"][tag]
    h = relu(z @ params["w4"].T + params["b4"])
    h = relu(h @ params["w5"].T + params["b5"])
    h = relu(h @ params["w6"].T + params["b6"])
    return h @ params["winv"].T + params["binv"]


if __name__ == "__main__":
    # Note: padding semantics mirror the torch module literally (emb.weight[0]=0,
    # lookup of x+1) — song id 0 maps to learned row 1, exactly as in torch.
    Nsongs = 500                   # deliberately NOT a multiple of 128 -> exercises padding
    dim = [32, 64, 128, 64]        # [D0, D1, D2, D3]
    Nmeta_classes = 6
    B, S = 2, 8
    TN = 128                       # small tile so the test exercises a multi-step grid

    key = jax.random.PRNGKey(0)
    kp, kx, kt = jax.random.split(key, 3)
    params = init_params(kp, Nsongs, dim, Nmeta_classes)

    x = jax.random.randint(kx, (B, S), 0, Nsongs, dtype=jnp.int32)
    tag = jax.random.randint(kt, (B,), 0, Nmeta_classes, dtype=jnp.int32)

    # ---- f32 projection weights: tight check against the reference ----
    prepped_f32 = prepare_params(params, proj_dtype=jnp.float32, tile_n=TN)

    xhat, _ = mlph6_forward(x, prepped_f32, tag=None)
    xhat = jax.block_until_ready(xhat)
    ref = mlph6_reference(x, params, tag=None)
    assert xhat.shape == (B, Nsongs)
    assert jnp.allclose(xhat, ref, atol=1e-4, rtol=1e-4)

    xhat_t, _ = mlph6_forward(x, prepped_f32, tag=tag)
    xhat_t = jax.block_until_ready(xhat_t)
    ref_t = mlph6_reference(x, params, tag=tag)
    assert jnp.allclose(xhat_t, ref_t, atol=1e-4, rtol=1e-4)

    # ---- bf16 projection weights (recommended production config): loose check ----
    prepped_bf16 = prepare_params(params, proj_dtype=jnp.bfloat16, tile_n=TN)
    xhat_b, _ = mlph6_forward(x, prepped_bf16, tag=tag)
    xhat_b = jax.block_until_ready(xhat_b)
    assert jnp.allclose(xhat_b, ref_t, atol=1e-1, rtol=5e-2)

    print("KERNEL_OK")
</pallas_src>

<mosaic_0001>
module attributes {stable_mosaic.version = 11 : i64} {
  func.func @mlp_kernel(%arg0: memref<2x32xf32, #tpu.memory_space<vmem>>, %arg1: memref<2x64xf32, #tpu.memory_space<vmem>>, %arg2: memref<32x64xf32, #tpu.memory_space<vmem>>, %arg3: memref<1x64xf32, #tpu.memory_space<vmem>>, %arg4: memref<64x128xf32, #tpu.memory_space<vmem>>, %arg5: memref<1x128xf32, #tpu.memory_space<vmem>>, %arg6: memref<128x64xf32, #tpu.memory_space<vmem>>, %arg7: memref<1x64xf32, #tpu.memory_space<vmem>>, %arg8: memref<64x128xf32, #tpu.memory_space<vmem>>, %arg9: memref<1x128xf32, #tpu.memory_space<vmem>>, %arg10: memref<128x64xf32, #tpu.memory_space<vmem>>, %arg11: memref<1x64xf32, #tpu.memory_space<vmem>>, %arg12: memref<64x32xf32, #tpu.memory_space<vmem>>, %arg13: memref<1x32xf32, #tpu.memory_space<vmem>>, %arg14: memref<2x32xf32, #tpu.memory_space<vmem>>) attributes {dimension_semantics = [], scalar_prefetch = 0 : i64, scratch_operands = 0 : i64, tpu.core_type = #tpu.core_type<tc>} {
    %c0 = arith.constant 0 : index
    %c0_0 = arith.constant 0 : index
    %0 = vector.load %arg0[%c0, %c0_0] : memref<2x32xf32, #tpu.memory_space<vmem>>, vector<2x32xf32>
    %cst = arith.constant 0.000000e+00 : f32
    %1 = vector.broadcast %cst : f32 to vector<2x32xf32>
    %2 = arith.maximumf %0, %1 : vector<2x32xf32>
    %c0_1 = arith.constant 0 : index
    %c0_2 = arith.constant 0 : index
    %3 = vector.load %arg2[%c0_1, %c0_2] : memref<32x64xf32, #tpu.memory_space<vmem>>, vector<32x64xf32>
    %cst_3 = arith.constant dense<0.000000e+00> : vector<2x64xf32>
    %4 = tpu.matmul %2, %3, %cst_3 {dimension_numbers = #tpu.dot_dimension_numbers<[1], [0], [0], [1], [0, 0, 1, 1], [], []>} : vector<2x32xf32>, vector<32x64xf32>, vector<2x64xf32> -> vector<2x64xf32>
    %c0_4 = arith.constant 0 : index
    %c0_5 = arith.constant 0 : index
    %5 = vector.load %arg3[%c0_4, %c0_5] : memref<1x64xf32, #tpu.memory_space<vmem>>, vector<1x64xf32>
    %6 = vector.broadcast %5 : vector<1x64xf32> to vector<2x64xf32>
    %7 = arith.addf %4, %6 : vector<2x64xf32>
    %cst_6 = arith.constant 0.000000e+00 : f32
    %8 = vector.broadcast %cst_6 : f32 to vector<2x64xf32>
    %9 = arith.maximumf %7, %8 : vector<2x64xf32>
    %c0_7 = arith.constant 0 : index
    %c0_8 = arith.constant 0 : index
    %10 = vector.load %arg4[%c0_7, %c0_8] : memref<64x128xf32, #tpu.memory_space<vmem>>, vector<64x128xf32>
    %cst_9 = arith.constant dense<0.000000e+00> : vector<2x128xf32>
    %11 = tpu.matmul %9, %10, %cst_9 {dimension_numbers = #tpu.dot_dimension_numbers<[1], [0], [0], [1], [0, 0, 1, 1], [], []>} : vector<2x64xf32>, vector<64x128xf32>, vector<2x128xf32> -> vector<2x128xf32>
    %c0_10 = arith.constant 0 : index
    %c0_11 = arith.constant 0 : index
    %12 = vector.load %arg5[%c0_10, %c0_11] : memref<1x128xf32, #tpu.memory_space<vmem>>, vector<1x128xf32>
    %13 = vector.broadcast %12 : vector<1x128xf32> to vector<2x128xf32>
    %14 = arith.addf %11, %13 : vector<2x128xf32>
    %cst_12 = arith.constant 0.000000e+00 : f32
    %15 = vector.broadcast %cst_12 : f32 to vector<2x128xf32>
    %16 = arith.maximumf %14, %15 : vector<2x128xf32>
    %c0_13 = arith.constant 0 : index
    %c0_14 = arith.constant 0 : index
    %17 = vector.load %arg6[%c0_13, %c0_14] : memref<128x64xf32, #tpu.memory_space<vmem>>, vector<128x64xf32>
    %cst_15 = arith.constant dense<0.000000e+00> : vector<2x64xf32>
    %18 = tpu.matmul %16, %17, %cst_15 {dimension_numbers = #tpu.dot_dimension_numbers<[1], [0], [0], [1], [0, 0, 1, 1], [], []>} : vector<2x128xf32>, vector<128x64xf32>, vector<2x64xf32> -> vector<2x64xf32>
    %c0_16 = arith.constant 0 : index
    %c0_17 = arith.constant 0 : index
    %19 = vector.load %arg7[%c0_16, %c0_17] : memref<1x64xf32, #tpu.memory_space<vmem>>, vector<1x64xf32>
    %20 = vector.broadcast %19 : vector<1x64xf32> to vector<2x64xf32>
    %21 = arith.addf %18, %20 : vector<2x64xf32>
    %cst_18 = arith.constant 0.000000e+00 : f32
    %22 = vector.broadcast %cst_18 : f32 to vector<2x64xf32>
    %23 = arith.maximumf %21, %22 : vector<2x64xf32>
    %c0_19 = arith.constant 0 : index
    %c0_20 = arith.constant 0 : index
    %24 = vector.load %arg1[%c0_19, %c0_20] : memref<2x64xf32, #tpu.memory_space<vmem>>, vector<2x64xf32>
    %25 = arith.addf %23, %24 : vector<2x64xf32>
    %c0_21 = arith.constant 0 : index
    %c0_22 = arith.constant 0 : index
    %26 = vector.load %arg8[%c0_21, %c0_22] : memref<64x128xf32, #tpu.memory_space<vmem>>, vector<64x128xf32>
    %cst_23 = arith.constant dense<0.000000e+00> : vector<2x128xf32>
    %27 = tpu.matmul %25, %26, %cst_23 {dimension_numbers = #tpu.dot_dimension_numbers<[1], [0], [0], [1], [0, 0, 1, 1], [], []>} : vector<2x64xf32>, vector<64x128xf32>, vector<2x128xf32> -> vector<2x128xf32>
    %c0_24 = arith.constant 0 : index
    %c0_25 = arith.constant 0 : index
    %28 = vector.load %arg9[%c0_24, %c0_25] : memref<1x128xf32, #tpu.memory_space<vmem>>, vector<1x128xf32>
    %29 = vector.broadcast %28 : vector<1x128xf32> to vector<2x128xf32>
    %30 = arith.addf %27, %29 : vector<2x128xf32>
    %cst_26 = arith.constant 0.000000e+00 : f32
    %31 = vector.broadcast %cst_26 : f32 to vector<2x128xf32>
    %32 = arith.maximumf %30, %31 : vector<2x128xf32>
    %c0_27 = arith.constant 0 : index
    %c0_28 = arith.constant 0 : index
    %33 = vector.load %arg10[%c0_27, %c0_28] : memref<128x64xf32, #tpu.memory_space<vmem>>, vector<128x64xf32>
    %cst_29 = arith.constant dense<0.000000e+00> : vector<2x64xf32>
    %34 = tpu.matmul %32, %33, %cst_29 {dimension_numbers = #tpu.dot_dimension_numbers<[1], [0], [0], [1], [0, 0, 1, 1], [], []>} : vector<2x128xf32>, vector<128x64xf32>, vector<2x64xf32> -> vector<2x64xf32>
    %c0_30 = arith.constant 0 : index
    %c0_31 = arith.constant 0 : index
    %35 = vector.load %arg11[%c0_30, %c0_31] : memref<1x64xf32, #tpu.memory_space<vmem>>, vector<1x64xf32>
    %36 = vector.broadcast %35 : vector<1x64xf32> to vector<2x64xf32>
    %37 = arith.addf %34, %36 : vector<2x64xf32>
    %cst_32 = arith.constant 0.000000e+00 : f32
    %38 = vector.broadcast %cst_32 : f32 to vector<2x64xf32>
    %39 = arith.maximumf %37, %38 : vector<2x64xf32>
    %c0_33 = arith.constant 0 : index
    %c0_34 = arith.constant 0 : index
    %40 = vector.load %arg12[%c0_33, %c0_34] : memref<64x32xf32, #tpu.memory_space<vmem>>, vector<64x32xf32>
    %cst_35 = arith.constant dense<0.000000e+00> : vector<2x32xf32>
    %41 = tpu.matmul %39, %40, %cst_35 {dimension_numbers = #tpu.dot_dimension_numbers<[1], [0], [0], [1], [0, 0, 1, 1], [], []>} : vector<2x64xf32>, vector<64x32xf32>, vector<2x32xf32> -> vector<2x32xf32>
    %c0_36 = arith.constant 0 : index
    %c0_37 = arith.constant 0 : index
    %42 = vector.load %arg13[%c0_36, %c0_37] : memref<1x32xf32, #tpu.memory_space<vmem>>, vector<1x32xf32>
    %43 = vector.broadcast %42 : vector<1x32xf32> to vector<2x32xf32>
    %44 = arith.addf %41, %43 : vector<2x32xf32>
    %cst_38 = arith.constant 0.000000e+00 : f32
    %45 = vector.broadcast %cst_38 : f32 to vector<2x32xf32>
    %46 = arith.maximumf %44, %45 : vector<2x32xf32>
    %c0_39 = arith.constant 0 : index
    %c0_40 = arith.constant 0 : index
    %47 = vector.load %arg14[%c0_39, %c0_40] : memref<2x32xf32, #tpu.memory_space<vmem>>, vector<2x32xf32>
    tpu.vector_store %arg14[%c0_39, %c0_40], %46 {strides = array<i32>} : memref<2x32xf32, #tpu.memory_space<vmem>>, vector<2x32xf32>,
    return
  }
}

</mosaic_0001>

<bundles_post_ra>
// kernel: tpu_custom_call.1
= control target key start
LH: loop header
LB: loop body
LE: loop exit
PB: predicated region body
PF: predicated region fallthrough
CT: control target
= control target key end

     0   :  { %v942_v3 = vmov 0.0|0.0   ;;  %vm943_vm0 = vmmov 0   ;;  %v944_v6 = vmov 0.0   ;;  %s1282_s0 = inlined_call_operand.vmem [shape: f32[2,32], index: 0, kind: input, shape index: {}]   ;;  %s1283_s1 = inlined_call_operand.vmem [shape: f32[2,64], index: 1, kind: input, shape index: {}]   ;;  %s1284_s2 = inlined_call_operand.vmem [shape: f32[32,64], index: 2, kind: input, shape index: {}]   ;;  %s1285_s3 = inlined_call_operand.vmem [shape: f32[1,64], index: 3, kind: input, shape index: {}]   ;;  %s1286_s4 = inlined_call_operand.vmem [shape: f32[64,128], index: 4, kind: input, shape index: {}]   ;;  %s1287_s5 = inlined_call_operand.vmem [shape: f32[1,128], index: 5, kind: input, shape index: {}]   ;;  %s1288_s6 = inlined_call_operand.vmem [shape: f32[128,64], index: 6, kind: input, shape index: {}]   ;;  %s1289_s7 = inlined_call_operand.vmem [shape: f32[1,64], index: 7, kind: input, shape index: {}]   ;;  %s1290_s8 = inlined_call_operand.vmem [shape: f32[64,128], index: 8, kind: input, shape index: {}]   ;;  %s1291_s9 = inlined_call_operand.vmem [shape: f32[1,128], index: 9, kind: input, shape index: {}]   ;;  %s1292_s10 = inlined_call_operand.vmem [shape: f32[128,64], index: 10, kind: input, shape index: {}]   ;;  %s1293_s11 = inlined_call_operand.vmem [shape: f32[1,64], index: 11, kind: input, shape index: {}]   ;;  %s1294_s12 = inlined_call_operand.vmem [shape: f32[64,32], index: 12, kind: input, shape index: {}]   ;;  %s1295_s13 = inlined_call_operand.vmem [shape: f32[1,32], index: 13, kind: input, shape index: {}]   ;;  %s1296_s14 = inlined_call_operand.hbm [shape: f32[2,32], index: 14, kind: output, shape index: {}]  }
   0x1   :  { %v50_v0 = vld [vmem:[%s1284_s2] sm:$0xff]  ;;  %v51_v1 = vld [vmem:[%s1284_s2 + $0x8] sm:$0xff]  ;;  %v52_v2 = vld [vmem:[%s1284_s2 + $0x10] sm:$0xff]  ;;  %824 = vmatprep.subr.bf16.mxu0 %v942_v3  ;;  %694 = vmatprep.mubr.msk.f32.mxu0 %vm943_vm0, %v944_v6 }
   0x2   :  { %v825_v4 = vpack.c.bf16 %v51_v1, %v50_v0  ;;  %v53_v5 = vld [vmem:[%s1284_s2 + $0x18] sm:$0xff]  ;;  %v136_v7 = vld [vmem:[%s1286_s4] sm:$0xff]  ;;  %830 = vmatprep.subr.bf16.mxu1 %v942_v3  ;;  %v137_v8 = vld [vmem:[%s1286_s4 + $0x8] sm:$0xff]  ;;  %713 = vmatprep.mubr.msk.f32.mxu1 %vm943_vm0, %v944_v6 }
   0x3   :  { %v138_v9 = vld [vmem:[%s1286_s4 + $0x10] sm:$0xff]  ;;  %v139_v10 = vld [vmem:[%s1286_s4 + $0x18] sm:$0xff]  ;;  %v828_v11 = vpack.c.bf16 %v53_v5, %v52_v2  ;;  %v48_v12 = vld [vmem:[%s1282_s0] sm:$0x3]  ;;  %v831_v13 = vpack.c.bf16 %v137_v8, %v136_v7 }
   0x4   :  { %826 = vmatpush3.bf16.msra.mxu0 %v825_v4 }
   0x5   :  { %827 = vmatprep.subr.bf16.mxu0 %v942_v3 }
   0x6   :  { %19 = vsyncpa [#allocation3], 0  ;;  %832 = vmatpush3.bf16.msra.mxu1 %v831_v13  ;;  %v834_v14 = vpack.c.bf16 %v139_v10, %v138_v9  ;;  %v49_v15 = vmax.f32 %v48_v12, 0.0  ;;  %v140_v16 = vld [vmem:[%s1286_s4 + $0x20] sm:$0xff]  ;;  %v141_v17 = vld [vmem:[%s1286_s4 + $0x28] sm:$0xff]  ;;  %vm61_vm1 = vcmask 261120  }
   0x7   :  { %833 = vmatprep.subr.bf16.mxu1 %v942_v3  ;;  %v837_v18 = vpack.c.bf16 %v141_v17, %v140_v16  ;;  %v142_v19 = vld [vmem:[%s1286_s4 + $0x30] sm:$0xff]  ;;  %v143_v20 = vld [vmem:[%s1286_s4 + $0x38] sm:$0xff]  ;;  %v226_v22 = vld [vmem:[%s1288_s6] sm:$0xff]  ;;  %vm151_vm2 = vcmask 523264   ;;  %vm594_vm3 = vcmask 254976  }
   0x8   :  { %829 = vmatpush3.bf16.msra.mxu0 %v828_v11  ;;  %v840_v21 = vpack.c.bf16 %v143_v20, %v142_v19  ;;  %v227_v23 = vld [vmem:[%s1288_s6 + $0x8] sm:$0xff]  ;;  %v228_v24 = vld [vmem:[%s1288_s6 + $0x10] sm:$0xff]  ;;  %v229_v26 = vld [vmem:[%s1288_s6 + $0x18] sm:$0xff] }
   0x9   :  { %842 = vmatprep.subr.bf16.mxu0 %v942_v3  ;;  %v843_v25 = vpack.c.bf16 %v227_v23, %v226_v22  ;;  %v846_v27 = vpack.c.bf16 %v229_v26, %v228_v24  ;;  %v230_v28 = vld [vmem:[%s1288_s6 + $0x20] sm:$0xff]  ;;  %v231_v29 = vld [vmem:[%s1288_s6 + $0x28] sm:$0xff]  ;;  %v232_v31 = vld [vmem:[%s1288_s6 + $0x30] sm:$0xff] }
   0xa   :  { %835 = vmatpush3.bf16.msra.mxu1 %v834_v14  ;;  %v849_v30 = vpack.c.bf16 %v231_v29, %v230_v28  ;;  %v233_v32 = vld [vmem:[%s1288_s6 + $0x38] sm:$0xff]  ;;  %v234_v34 = vld [vmem:[%s1288_s6 + $0x40] sm:$0xff]  ;;  %v235_v35 = vld [vmem:[%s1288_s6 + $0x48] sm:$0xff] }
   0xb   :  { %695 = vmatmul.mubr.msk.f32.vlgmr.msra.gmra.mrb[0].mxu0 %vm61_vm1, %v49_v15  ;;  %836 = vmatprep.subr.bf16.mxu1 %v942_v3  ;;  %v852_v33 = vpack.c.bf16 %v233_v32, %v232_v31  ;;  %v855_v36 = vpack.c.bf16 %v235_v35, %v234_v34  ;;  %v236_v37 = vld [vmem:[%s1288_s6 + $0x50] sm:$0xff]  ;;  %v237_v38 = vld [vmem:[%s1288_s6 + $0x58] sm:$0xff]  ;;  %v238_v40 = vld [vmem:[%s1288_s6 + $0x60] sm:$0xff] }
   0xc   :  { %748 = vmatprep.mubr.msk.f32.mxu0 %vm943_vm0, %v944_v6  ;;  %844 = vmatpush3.bf16.msra.mxu0 %v843_v25  ;;  %v858_v39 = vpack.c.bf16 %v237_v38, %v236_v37  ;;  %v239_v41 = vld [vmem:[%s1288_s6 + $0x68] sm:$0xff]  ;;  %v610_v43 = vld [vmem:[%s1285_s3] ss:$0 sm:$0xff]  ;;  %v240_v48 = vld [vmem:[%s1288_s6 + $0x70] sm:$0xff] }
   0xd   :  { %845 = vmatprep.subr.bf16.mxu0 %v942_v3  ;;  %v861_v42 = vpack.c.bf16 %v239_v41, %v238_v40  ;;  %v241_v49 = vld [vmem:[%s1288_s6 + $0x78] sm:$0xff]  ;;  %v322_v51 = vld [vmem:[%s1290_s8] sm:$0xff]  ;;  %v323_v52 = vld [vmem:[%s1290_s8 + $0x8] sm:$0xff] }
   0xe   :  { %838 = vmatpush3.bf16.msra.mxu1 %v837_v18  ;;  %v864_v50 = vpack.c.bf16 %v241_v49, %v240_v48  ;;  %v324_v53 = vld [vmem:[%s1290_s8 + $0x10] sm:$0xff]  ;;  %v867_v54 = vpack.c.bf16 %v323_v52, %v322_v51  ;;  %v325_v55 = vld [vmem:[%s1290_s8 + $0x18] sm:$0xff]  ;;  %v612_v57 = vld [vmem:[%s1287_s5] ss:$0 sm:$0xff] }
   0xf   :  { %839 = vmatprep.subr.bf16.mxu1 %v942_v3  ;;  %v870_v56 = vpack.c.bf16 %v325_v55, %v324_v53  ;;  %v326_v62 = vld [vmem:[%s1290_s8 + $0x20] sm:$0xff]  ;;  %v327_v63 = vld [vmem:[%s1290_s8 + $0x28] sm:$0xff]  ;;  %v328_v1 = vld [vmem:[%s1290_s8 + $0x30] sm:$0xff] }
  0x10   :  { %847 = vmatpush3.bf16.msra.mxu0 %v846_v27  ;;  %v873_v0 = vpack.c.bf16 %v327_v63, %v326_v62  ;;  %v329_v2 = vld [vmem:[%s1290_s8 + $0x38] sm:$0xff]  ;;  %v614_v5 = vld [vmem:[%s1289_s7] ss:$0 sm:$0xff]  ;;  %v412_v11 = vld [vmem:[%s1292_s10 + $0x8] sm:$0xff]  ;;  %s945_s8 = smov [#allocation2]  }
  0x11   :  { %848 = vmatprep.subr.bf16.mxu0 %v942_v3  ;;  %v876_v4 = vpack.c.bf16 %v329_v2, %v328_v1  ;;  %v411_v10 = vld [vmem:[%s1292_s10] sm:$0xff]  ;;  %v413_v16 = vld [vmem:[%s1292_s10 + $0x10] sm:$0xff]  ;;  %v414_v17 = vld [vmem:[%s1292_s10 + $0x18] sm:$0xff]  ;;  %s602_s18 = sshll.u32 %s945_s8, 4  ;;  %s603_s18 = int_to_ptr.vmem [resolvable:$true] %s602_s18 }
  0x12   :  { %841 = vmatpush3.bf16.msra.mxu1 %v840_v21  ;;  %v320_v12 = vld [vmem:[%s1283_s1] sm:$0x3]  ;;  %v879_v14 = vpack.c.bf16 %v412_v11, %v411_v10  ;;  %v882_v18 = vpack.c.bf16 %v414_v17, %v413_v16  ;;  %v416_v20 = vld [vmem:[%s1292_s10 + $0x28] sm:$0xff]  ;;  %v417_v22 = vld [vmem:[%s1292_s10 + $0x30] sm:$0xff]  ;;  %p923_p1 = scmp.lt.s32.totalorder %s603_s18, %s603_s18 }
  0x13   :  { %866 = vmatprep.subr.bf16.mxu1 %v942_v3  ;;  %v415_v19 = vld [vmem:[%s1292_s10 + $0x20] sm:$0xff]  ;;  %v420_v25 = vld [vmem:[%s1292_s10 + $0x48] sm:$0xff]  ;;  %v421_v27 = vld [vmem:[%s1292_s10 + $0x50] sm:$0xff] }
  0x14   :  { %850 = vmatpush3.bf16.msra.mxu0 %v849_v30  ;;  %v885_v21 = vpack.c.bf16 %v416_v20, %v415_v19  ;;  %v419_v24 = vld [vmem:[%s1292_s10 + $0x40] sm:$0xff]  ;;  %v422_v28 = vld [vmem:[%s1292_s10 + $0x58] sm:$0xff]  ;;  %v424_v31 = vld [vmem:[%s1292_s10 + $0x68] sm:$0xff] }
  0x15   :  { %851 = vmatprep.subr.bf16.mxu0 %v942_v3  ;;  %v891_v26 = vpack.c.bf16 %v420_v25, %v419_v24  ;;  %v894_v29 = vpack.c.bf16 %v422_v28, %v421_v27  ;;  %v423_v30 = vld [vmem:[%s1292_s10 + $0x60] sm:$0xff]  ;;  %v426_v34 = vld [vmem:[%s1292_s10 + $0x78] sm:$0xff]  ;;  %v506_v37 = vld [vmem:[%s1294_s12 + $0x8] sm:$0xff] }
  0x16   :  { %v897_v32 = vpack.c.bf16 %v424_v31, %v423_v30  ;;  %v507_v38 = vld [vmem:[%s1294_s12 + $0x10] sm:$0xff]  ;;  %v508_v40 = vld [vmem:[%s1294_s12 + $0x18] sm:$0xff] }
  0x17   :  { %v906_v41 = vpack.c.bf16 %v508_v40, %v507_v38  ;;  %v512_v51 = vld [vmem:[%s1294_s12 + $0x38] sm:$0xff] }
  0x18   :  { %853 = vmatpush3.bf16.msra.mxu0 %v852_v33  ;;  %v425_v33 = vld [vmem:[%s1292_s10 + $0x70] sm:$0xff] }
  0x19   :  { %854 = vmatprep.subr.bf16.mxu0 %v942_v3  ;;  %v900_v35 = vpack.c.bf16 %v426_v34, %v425_v33 }
  0x1c   :  { %856 = vmatpush3.bf16.msra.mxu0 %v855_v36  ;;  %v505_v36 = vld [vmem:[%s1294_s12] sm:$0xff] }
  0x1d   :  { %857 = vmatprep.subr.bf16.mxu0 %v942_v3 }
  0x20   :  { %859 = vmatpush3.bf16.msra.mxu0 %v858_v39  ;;  %v903_v39 = vpack.c.bf16 %v506_v37, %v505_v36 }
  0x21   :  { %860 = vmatprep.subr.bf16.mxu0 %v942_v3 }
  0x24   :  { %862 = vmatpush3.bf16.msra.mxu0 %v861_v42  ;;  %v509_v42 = vld [vmem:[%s1294_s12 + $0x20] sm:$0xff] }
  0x25   :  { %863 = vmatprep.subr.bf16.mxu0 %v942_v3 }
  0x28   :  { %865 = vmatpush3.bf16.msra.mxu0 %v864_v50  ;;  %v511_v50 = vld [vmem:[%s1294_s12 + $0x30] sm:$0xff] }
  0x29   :  { %902 = vmatprep.subr.bf16.mxu0 %v942_v3  ;;  %v912_v52 = vpack.c.bf16 %v512_v51, %v511_v50 }
  0xde   :  { %v131_v44 = vpop.f32.mrb[0].mxu0 }
  0xdf   :  { %v132_v45 = vadd.f32 %v610_v43, %v131_v44  ;;  %v696_v46 = vpop.f32.mrb[1].mxu0  ;;  %v510_v43 = vld [vmem:[%s1294_s12 + $0x28] sm:$0xff] }
  0xe0   :  { %v909_v44 = vpack.c.bf16 %v510_v43, %v509_v42 }
  0xe1   :  { %v135_v47 = vmax.f32 %v132_v45, 0.0  ;;  %v615_v45 = vld [vmem:[%s1291_s9] ss:$0 sm:$0xff] }
  0xe3   :  { %714 = vmatmul.mubr.msk.f32.vlgmr.msra.gmra.mrb[0].mxu1 %vm151_vm2, %v135_v47 }
  0xe4   :  { %767 = vmatprep.mubr.msk.f32.mxu1 %vm943_vm0, %v944_v6  ;;  %868 = vmatpush3.bf16.msra.mxu1 %v867_v54 }
  0xe5   :  { %869 = vmatprep.subr.bf16.mxu1 %v942_v3 }
  0xe8   :  { %871 = vmatpush3.bf16.msra.mxu1 %v870_v56 }
  0xe9   :  { %872 = vmatprep.subr.bf16.mxu1 %v942_v3 }
  0xec   :  { %874 = vmatpush3.bf16.msra.mxu1 %v873_v0 }
  0xed   :  { %875 = vmatprep.subr.bf16.mxu1 %v942_v3 }
  0xf0   :  { %877 = vmatpush3.bf16.msra.mxu1 %v876_v4 }
  0xf1   :  { %878 = vmatprep.subr.bf16.mxu1 %v942_v3 }
 0x1b6   :  { %v221_v58 = vpop.f32.mrb[0].mxu1 }
 0x1b7   :  { %v222_v59 = vadd.f32 %v612_v57, %v221_v58  ;;  %v715_v60 = vpop.f32.mrb[1].mxu1  ;;  %v618_v57 = vld [vmem:[%s1295_s13] ss:$0 sm:$0xff] }
 0x1b9   :  { %v225_v61 = vmax.f32 %v222_v59, 0.0 }
 0x1bb   :  { %749 = vmatmul.mubr.f32.vlgmr.msra.gmra.mrb[2].mxu0 %v225_v61 }
 0x1bc   :  { %821 = vmatprep.mubr.msk.f32.mxu0 %vm943_vm0, %v944_v6  ;;  %904 = vmatpush3.bf16.msra.mxu0 %v903_v39 }
 0x1bd   :  { %905 = vmatprep.subr.bf16.mxu0 %v942_v3 }
 0x1c0   :  { %907 = vmatpush3.bf16.msra.mxu0 %v906_v41 }
 0x1c1   :  { %908 = vmatprep.subr.bf16.mxu0 %v942_v3 }
 0x1c4   :  { %910 = vmatpush3.bf16.msra.mxu0 %v909_v44 }
 0x1c5   :  { %911 = vmatprep.subr.bf16.mxu0 %v942_v3 }
 0x1c8   :  { %913 = vmatpush3.bf16.msra.mxu0 %v912_v52 }
 0x28e   :  { %v315_v7 = vpop.f32.mrb[2].mxu0 }
 0x28f   :  { %v316_v8 = vadd.f32 %v614_v5, %v315_v7  ;;  %v750_v9 = vpop.f32.mrb[3].mxu0 }
 0x291   :  { %v319_v13 = vmax.f32 %v316_v8, 0.0 }
 0x293   :  { %v321_v15 = vadd.f32 %v320_v12, %v319_v13 }
 0x295   :  { %768 = vmatmul.mubr.msk.f32.vlgmr.msra.gmra.mrb[2].mxu1 %vm151_vm2, %v321_v15 }
 0x296   :  { %880 = vmatpush3.bf16.msra.mxu1 %v879_v14  ;;  %802 = vmatprep.mubr.msk.f32.mxu1 %vm943_vm0, %v944_v6  ;;  %v418_v6 = vld [vmem:[%s1292_s10 + $0x38] sm:$0xff] }
 0x297   :  { %881 = vmatprep.subr.bf16.mxu1 %v942_v3  ;;  %v888_v23 = vpack.c.bf16 %v418_v6, %v417_v22 }
 0x29a   :  { %883 = vmatpush3.bf16.msra.mxu1 %v882_v18 }
 0x29b   :  { %884 = vmatprep.subr.bf16.mxu1 %v942_v3 }
 0x29e   :  { %886 = vmatpush3.bf16.msra.mxu1 %v885_v21 }
 0x29f   :  { %887 = vmatprep.subr.bf16.mxu1 %v942_v3 }
 0x2a2   :  { %889 = vmatpush3.bf16.msra.mxu1 %v888_v23 }
 0x2a3   :  { %890 = vmatprep.subr.bf16.mxu1 %v942_v3 }
 0x2a6   :  { %892 = vmatpush3.bf16.msra.mxu1 %v891_v26 }
 0x2a7   :  { %893 = vmatprep.subr.bf16.mxu1 %v942_v3 }
 0x2aa   :  { %895 = vmatpush3.bf16.msra.mxu1 %v894_v29 }
 0x2ab   :  { %896 = vmatprep.subr.bf16.mxu1 %v942_v3 }
 0x2ae   :  { %898 = vmatpush3.bf16.msra.mxu1 %v897_v32 }
 0x2af   :  { %899 = vmatprep.subr.bf16.mxu1 %v942_v3  ;;  %v617_v3 = vld [vmem:[%s1293_s11] ss:$0 sm:$0xff]  ;;  %s918_s11 = scalar_lea.vmem %s603_s18, 32 }
 0x2b0   :  { %p919_p0 = scmp.ne.s32.totalorder %s603_s18, %s918_s11  ;;  %p924_p2 = scmp.lt.s32.totalorder %s918_s11, %s918_s11 }
 0x2b2   :  { %901 = vmatpush3.bf16.msra.mxu1 %v900_v35  ;;  %p925_p3 = por %p924_p2, %p923_p1 }
 0x2b4   :  { %p926_p4 = pnand %p925_p3, %p919_p0 }
 0x368   :  { %v406_v46 = vpop.f32.mrb[2].mxu1 }
 0x369   :  { %v407_v47 = vadd.f32 %v615_v45, %v406_v46  ;;  %v769_v48 = vpop.f32.mrb[3].mxu1 }
 0x36b   :  { %v410_v49 = vmax.f32 %v407_v47, 0.0 }
 0x36d   :  { %803 = vmatmul.mubr.f32.vlgmr.msra.gmra.mrb[4].mxu1 %v410_v49 }
 0x440   :  { %v500_v53 = vpop.f32.mrb[4].mxu1 }
 0x441   :  { %v501_v54 = vadd.f32 %v617_v3, %v500_v53  ;;  %v804_v55 = vpop.f32.mrb[5].mxu1 }
 0x443   :  { %v504_v56 = vmax.f32 %v501_v54, 0.0 }
 0x445   :  { %822 = vmatmul.mubr.msk.f32.vlgmr.msra.gmra.mrb[4].mxu0 %vm151_vm2, %v504_v56 }
 0x518   :  { %v589_v58 = vpop.f32.mrb[4].mxu0 }
 0x519   :  { %v590_v59 = vadd.f32 %v618_v57, %v589_v58  ;;  %v823_v60 = vpop.f32.mrb[5].mxu0 }
 0x51b   :  { %v593_v61 = vmax.f32 %v590_v59, 0.0 }
 0x51d   :  { %595 = vst.msk [vmem:[#allocation2] sm:$0x3] %vm594_vm3, %v593_v61 }
 0x51e   :  { %929 = shalt.err (!%p926_p4)
}
 0x51f   :  { %s930_s13 = scalar_lea.hbm %s1296_s14, 32 }
 0x520   :  { %p931_p5 = scmp.ne.s32.totalorder %s1296_s14, %s930_s13  ;;  %p934_p6 = scmp.lt.u32.totalorder %s930_s13, %s1296_s14 }
 0x522   :  { %p936_p7 = pnand %p934_p6, %p931_p5 }
 0x524   :  { %939 = shalt.err (!%p936_p7)
}
 0x525   :  { %605 = dma.vmem_to_hbm [thread:$0]  %s603_s18, 32, %s1296_s14, [#allocation3]  }
 0x526   :  { %940 = dma.done.wait [#allocation3], 32  }
 0x527   :  { %941 = vsyncadd [#allocation3], 4294967264 }
 0x528   :  { %609 = vsyncpa [#allocation3], 1 }

</bundles_post_ra>
